<compile_context>
chip_gen: v6e
topology: v6e:2x2x1
jax: 0.10.0
libtpu: 0.0.40
codegen_flags: <defaults>
</compile_context>

<pallas_src>
import functools

import jax
import jax.numpy as jnp
from jax import lax
from jax.experimental import pallas as pl
from jax.experimental.pallas import tpu as pltpu


PAD = 128  # halo width (lane-tile aligned) in the flattened-spatial scratch


def basic_block_kernel(x_ref, w1_ref, b1_ref, w2_ref, b2_ref, o_ref, halo_ref,
                       *, W):
    """One batch element of the BasicBlock forward.

    x_ref   : (1, C, L)       f32   input, spatial flattened row-major (L=H*W)
    w1_ref  : (C, 9*C)        bf16  conv1 weights, BN1 scale folded in,
                                    column index = (dy*3+dx)*C + ci
    b1_ref  : (C, 1)          f32   BN1 folded bias
    w2_ref  : (C, 9*C)        bf16  conv2 weights, BN2 scale folded in
    b2_ref  : (C, 1)          f32   BN2 folded bias
    o_ref   : (1, C, L)       f32   output
    halo_ref: (C, PAD+L+PAD)  f32   VMEM scratch; zero halos = row padding
    """
    C = o_ref.shape[1]
    L = o_ref.shape[2]

    # Re-zero only the halos (2 vregs per step). Cheap, and correct regardless
    # of how the batch grid is split across TensorCores.
    halo_ref[:, :PAD] = jnp.zeros((C, PAD), jnp.float32)
    halo_ref[:, PAD + L:] = jnp.zeros((C, PAD), jnp.float32)

    x = x_ref[0]  # (C, L) f32; also the residual

    # Column-validity masks: the flat layout has no column padding, so taps
    # with dx == 0 / dx == 2 must not read across a row boundary.
    col = lax.broadcasted_iota(jnp.int32, (C, L), 1) % W
    col_masks = (col > 0, None, col < (W - 1))  # for dx = 0, 1, 2

    def conv3x3(w_bf16):
        # Build the (9C, L) patch from 9 lane-shifted views of the halo
        # buffer (each piece is exactly C=8 sublanes -> tile-aligned stack),
        # then do a single MXU matmul with K = 9C.
        pieces = []
        for tap in range(9):
            dy, dx = tap // 3, tap % 3
            off = (dy - 1) * W + (dx - 1)
            piece = halo_ref[:, PAD + off: PAD + off + L]  # (C, L) f32
            mask = col_masks[dx]
            if mask is not None:
                piece = jnp.where(mask, piece, 0.0)
            pieces.append(piece)
        patch = jnp.concatenate(pieces, axis=0).astype(jnp.bfloat16)  # (9C, L)
        return jnp.dot(w_bf16, patch, preferred_element_type=jnp.float32)

    # ---- conv1 (+ folded bn1 scale) + bias + relu, f32 elementwise ----
    halo_ref[:, PAD:PAD + L] = x
    out1 = jnp.maximum(conv3x3(w1_ref[...]) + b1_ref[...], 0.0)  # (C, L) f32

    # ---- conv2 (+ folded bn2 scale) + bias + residual + relu ----
    halo_ref[:, PAD:PAD + L] = out1
    out2 = conv3x3(w2_ref[...]) + b2_ref[...]
    o_ref[0] = jnp.maximum(out2 + x, 0.0)


@jax.jit
def basic_block_forward(x_nchw, w1_oihw, bn1, w2_oihw, bn2):
    """BasicBlock forward. x_nchw: (N, C, H, W) f32. Returns (N, C, H, W)."""
    eps = 1e-5
    g1, be1, m1, v1 = bn1
    g2, be2, m2, v2 = bn2

    # Fold inference-mode BN into per-channel scale/bias (f32).
    s1 = g1 / jnp.sqrt(v1 + eps)
    b1 = be1 - m1 * s1
    s2 = g2 / jnp.sqrt(v2 + eps)
    b2 = be2 - m2 * s2

    N, C, H, W = x_nchw.shape
    L = H * W
    x_flat = x_nchw.reshape(N, C, L)  # free reshape; no pad, no transpose

    def pack_weights(w_oihw, scale):
        # OIHW -> (Cout, 3, 3, Cin) -> (Cout, 9*Cin); col = (dy*3+dx)*Cin + ci.
        # Fold the per-output-channel BN scale in f32, then cast to bf16.
        c_out, c_in = w_oihw.shape[0], w_oihw.shape[1]
        w = jnp.transpose(w_oihw, (0, 2, 3, 1)).reshape(c_out, 9 * c_in)
        return (w * scale[:, None]).astype(jnp.bfloat16)

    w1p = pack_weights(w1_oihw, s1)
    w2p = pack_weights(w2_oihw, s2)

    kernel = functools.partial(basic_block_kernel, W=W)

    out_flat = pl.pallas_call(
        kernel,
        out_shape=jax.ShapeDtypeStruct((N, C, L), jnp.float32),
        grid_spec=pltpu.PrefetchScalarGridSpec(
            num_scalar_prefetch=0,
            grid=(N,),
            in_specs=[
                pl.BlockSpec((1, C, L), lambda n: (n, 0, 0)),
                pl.BlockSpec((C, 9 * C), lambda n: (0, 0)),
                pl.BlockSpec((C, 1), lambda n: (0, 0)),
                pl.BlockSpec((C, 9 * C), lambda n: (0, 0)),
                pl.BlockSpec((C, 1), lambda n: (0, 0)),
            ],
            out_specs=pl.BlockSpec((1, C, L), lambda n: (n, 0, 0)),
            scratch_shapes=[pltpu.VMEM((C, PAD + L + PAD), jnp.float32)],
        ),
        compiler_params=pltpu.CompilerParams(
            dimension_semantics=("parallel",)),  # batch axis feeds both v7x cores
    )(x_flat, w1p, b1.reshape(C, 1), w2p, b2.reshape(C, 1))

    return out_flat.reshape(N, C, H, W)


def _reference(x_nchw, w1_oihw, bn1, w2_oihw, bn2):
    """Pure-JAX reference (inference-mode BN), NCHW."""
    eps = 1e-5

    def conv3x3(x, w):
        return lax.conv_general_dilated(
            x, w, window_strides=(1, 1), padding=((1, 1), (1, 1)),
            dimension_numbers=("NCHW", "OIHW", "NCHW"))

    def bn(x, params):
        g, b, m, v = params
        sh = (1, -1, 1, 1)
        return (x - m.reshape(sh)) / jnp.sqrt(v.reshape(sh) + eps) * \
            g.reshape(sh) + b.reshape(sh)

    out = jnp.maximum(bn(conv3x3(x_nchw, w1_oihw), bn1), 0.0)
    out = bn(conv3x3(out, w2_oihw), bn2)
    return jnp.maximum(out + x_nchw, 0.0)


if __name__ == "__main__":
    # Small shapes: batch=2, inplanes=planes=8, spatial=16x16 (H*W = 256).
    N, C, H, W = 2, 8, 16, 16

    key = jax.random.PRNGKey(0)
    ks = jax.random.split(key, 11)
    x = jax.random.normal(ks[0], (N, C, H, W), jnp.float32)

    # Deterministic synthetic parameters (no checkpoint load).
    w1 = jax.random.normal(ks[1], (C, C, 3, 3), jnp.float32) * 0.1
    w2 = jax.random.normal(ks[2], (C, C, 3, 3), jnp.float32) * 0.1
    bn1 = (jax.random.uniform(ks[3], (C,), jnp.float32, 0.5, 1.5),   # gamma
           jax.random.normal(ks[4], (C,), jnp.float32) * 0.1,        # beta
           jax.random.normal(ks[5], (C,), jnp.float32) * 0.1,        # running_mean
           jax.random.uniform(ks[6], (C,), jnp.float32, 0.5, 1.5))   # running_var
    bn2 = (jax.random.uniform(ks[7], (C,), jnp.float32, 0.5, 1.5),
           jax.random.normal(ks[8], (C,), jnp.float32) * 0.1,
           jax.random.normal(ks[9], (C,), jnp.float32) * 0.1,
           jax.random.uniform(ks[10], (C,), jnp.float32, 0.5, 1.5))

    out = basic_block_forward(x, w1, bn1, w2, bn2)
    out = jax.block_until_ready(out)

    ref = _reference(x, w1, bn1, w2, bn2)
    assert out.shape == (N, C, H, W)
    max_err = float(jnp.max(jnp.abs(out - ref)))
    # bf16 MXU inputs with f32 accumulation -> bf16-level tolerance vs f32 ref.
    assert jnp.allclose(out, ref, atol=5e-2, rtol=5e-2), f"max err {max_err}"

    print("KERNEL_OK")
</pallas_src>

<mosaic_0001>
module attributes {stable_mosaic.version = 11 : i64} {
  func.func @basic_block_kernel(%arg0: i32, %arg1: memref<1x8x256xf32, #tpu.memory_space<vmem>>, %arg2: memref<8x72xbf16, #tpu.memory_space<vmem>>, %arg3: memref<8x1xf32, #tpu.memory_space<vmem>>, %arg4: memref<8x72xbf16, #tpu.memory_space<vmem>>, %arg5: memref<8x1xf32, #tpu.memory_space<vmem>>, %arg6: memref<1x8x256xf32, #tpu.memory_space<vmem>>, %arg7: memref<8x512xf32, #tpu.memory_space<vmem>>) attributes {dimension_semantics = [#tpu.dimension_semantics<parallel>], iteration_bounds = array<i64: 2>, scalar_prefetch = 0 : i64, scratch_operands = 1 : i64, tpu.core_type = #tpu.core_type<tc>, window_params = [{transform_indices = @transform_0, window_bounds = array<i64: 1, 8, 256>}, {pipeline_mode = #tpu.pipeline_mode<synchronous>, transform_indices = @transform_1, window_bounds = array<i64: 8, 72>}, {pipeline_mode = #tpu.pipeline_mode<synchronous>, transform_indices = @transform_2, window_bounds = array<i64: 8, 1>}, {pipeline_mode = #tpu.pipeline_mode<synchronous>, transform_indices = @transform_3, window_bounds = array<i64: 8, 72>}, {pipeline_mode = #tpu.pipeline_mode<synchronous>, transform_indices = @transform_4, window_bounds = array<i64: 8, 1>}, {transform_indices = @transform_5, window_bounds = array<i64: 1, 8, 256>}]} {
    %cst = arith.constant 0.000000e+00 : f32
    %0 = vector.broadcast %cst : f32 to vector<8x128xf32>
    %c0 = arith.constant 0 : index
    %c0_0 = arith.constant 0 : index
    %1 = vector.load %arg7[%c0, %c0_0] : memref<8x512xf32, #tpu.memory_space<vmem>>, vector<8x128xf32>
    tpu.vector_store %arg7[%c0, %c0_0], %0 {strides = array<i32>} : memref<8x512xf32, #tpu.memory_space<vmem>>, vector<8x128xf32>,
    %cst_1 = arith.constant 0.000000e+00 : f32
    %2 = vector.broadcast %cst_1 : f32 to vector<8x128xf32>
    %c0_2 = arith.constant 0 : index
    %c384 = arith.constant 384 : index
    %3 = vector.load %arg7[%c0_2, %c384] : memref<8x512xf32, #tpu.memory_space<vmem>>, vector<8x128xf32>
    tpu.vector_store %arg7[%c0_2, %c384], %2 {strides = array<i32>} : memref<8x512xf32, #tpu.memory_space<vmem>>, vector<8x128xf32>,
    %c0_3 = arith.constant 0 : index
    %c0_4 = arith.constant 0 : index
    %c0_5 = arith.constant 0 : index
    %4 = vector.load %arg1[%c0_3, %c0_4, %c0_5] : memref<1x8x256xf32, #tpu.memory_space<vmem>>, vector<1x8x256xf32>
    %5 = vector.shape_cast %4 : vector<1x8x256xf32> to vector<8x256xf32>
    %6 = tpu.iota {dimensions = array<i32: 1>} : vector<8x256xi32>
    %c16_i32 = arith.constant 16 : i32
    %c0_i32 = arith.constant 0 : i32
    %7 = arith.cmpi eq, %c16_i32, %c0_i32 : i32
    %c1_i32 = arith.constant 1 : i32
    %8 = arith.select %7, %c1_i32, %c16_i32 : i32
    %9 = vector.broadcast %8 : i32 to vector<8x256xi32>
    %10 = arith.remsi %6, %9 : vector<8x256xi32>
    %c0_i32_6 = arith.constant 0 : i32
    %11 = vector.broadcast %c0_i32_6 : i32 to vector<8x256xi32>
    %12 = arith.cmpi ne, %10, %11 : vector<8x256xi32>
    %c0_i32_7 = arith.constant 0 : i32
    %13 = vector.broadcast %c0_i32_7 : i32 to vector<8x256xi32>
    %14 = arith.cmpi slt, %10, %13 : vector<8x256xi32>
    %c0_i32_8 = arith.constant 0 : i32
    %15 = arith.cmpi slt, %8, %c0_i32_8 : i32
    %16 = vector.broadcast %15 : i1 to vector<8x256xi1>
    %17 = vector.broadcast %16 : vector<8x256xi1> to vector<8x256xi1>
    %18 = arith.xori %14, %17 : vector<8x256xi1>
    %19 = arith.andi %18, %12 : vector<8x256xi1>
    %20 = vector.broadcast %8 : i32 to vector<8x256xi32>
    %21 = arith.addi %10, %20 : vector<8x256xi32>
    %22 = arith.select %19, %21, %10 : vector<8x256xi1>, vector<8x256xi32>
    %c0_i32_9 = arith.constant 0 : i32
    %23 = vector.broadcast %c0_i32_9 : i32 to vector<8x256xi32>
    %24 = arith.cmpi sgt, %22, %23 : vector<8x256xi32>
    %c15_i32 = arith.constant 15 : i32
    %25 = vector.broadcast %c15_i32 : i32 to vector<8x256xi32>
    %26 = arith.cmpi slt, %22, %25 : vector<8x256xi32>
    %c0_10 = arith.constant 0 : index
    %c128 = arith.constant 128 : index
    %27 = vector.load %arg7[%c0_10, %c128] : memref<8x512xf32, #tpu.memory_space<vmem>>, vector<8x256xf32>
    tpu.vector_store %arg7[%c0_10, %c128], %5 {strides = array<i32>} : memref<8x512xf32, #tpu.memory_space<vmem>>, vector<8x256xf32>,
    %c0_11 = arith.constant 0 : index
    %c0_12 = arith.constant 0 : index
    %28 = vector.load %arg2[%c0_11, %c0_12] : memref<8x72xbf16, #tpu.memory_space<vmem>>, vector<8x72xbf16>
    %c0_13 = arith.constant 0 : index
    %c111 = arith.constant 111 : index
    %29 = vector.load %arg7[%c0_13, %c111] : memref<8x512xf32, #tpu.memory_space<vmem>>, vector<8x256xf32>
    %cst_14 = arith.constant 0.000000e+00 : f32
    %30 = vector.broadcast %cst_14 : f32 to vector<8x256xf32>
    %31 = arith.select %24, %29, %30 : vector<8x256xi1>, vector<8x256xf32>
    %c0_15 = arith.constant 0 : index
    %c112 = arith.constant 112 : index
    %32 = vector.load %arg7[%c0_15, %c112] : memref<8x512xf32, #tpu.memory_space<vmem>>, vector<8x256xf32>
    %c0_16 = arith.constant 0 : index
    %c113 = arith.constant 113 : index
    %33 = vector.load %arg7[%c0_16, %c113] : memref<8x512xf32, #tpu.memory_space<vmem>>, vector<8x256xf32>
    %cst_17 = arith.constant 0.000000e+00 : f32
    %34 = vector.broadcast %cst_17 : f32 to vector<8x256xf32>
    %35 = arith.select %26, %33, %34 : vector<8x256xi1>, vector<8x256xf32>
    %c0_18 = arith.constant 0 : index
    %c127 = arith.constant 127 : index
    %36 = vector.load %arg7[%c0_18, %c127] : memref<8x512xf32, #tpu.memory_space<vmem>>, vector<8x256xf32>
    %cst_19 = arith.constant 0.000000e+00 : f32
    %37 = vector.broadcast %cst_19 : f32 to vector<8x256xf32>
    %38 = arith.select %24, %36, %37 : vector<8x256xi1>, vector<8x256xf32>
    %c0_20 = arith.constant 0 : index
    %c128_21 = arith.constant 128 : index
    %39 = vector.load %arg7[%c0_20, %c128_21] : memref<8x512xf32, #tpu.memory_space<vmem>>, vector<8x256xf32>
    %c0_22 = arith.constant 0 : index
    %c129 = arith.constant 129 : index
    %40 = vector.load %arg7[%c0_22, %c129] : memref<8x512xf32, #tpu.memory_space<vmem>>, vector<8x256xf32>
    %cst_23 = arith.constant 0.000000e+00 : f32
    %41 = vector.broadcast %cst_23 : f32 to vector<8x256xf32>
    %42 = arith.select %26, %40, %41 : vector<8x256xi1>, vector<8x256xf32>
    %c0_24 = arith.constant 0 : index
    %c143 = arith.constant 143 : index
    %43 = vector.load %arg7[%c0_24, %c143] : memref<8x512xf32, #tpu.memory_space<vmem>>, vector<8x256xf32>
    %cst_25 = arith.constant 0.000000e+00 : f32
    %44 = vector.broadcast %cst_25 : f32 to vector<8x256xf32>
    %45 = arith.select %24, %43, %44 : vector<8x256xi1>, vector<8x256xf32>
    %c0_26 = arith.constant 0 : index
    %c144 = arith.constant 144 : index
    %46 = vector.load %arg7[%c0_26, %c144] : memref<8x512xf32, #tpu.memory_space<vmem>>, vector<8x256xf32>
    %c0_27 = arith.constant 0 : index
    %c145 = arith.constant 145 : index
    %47 = vector.load %arg7[%c0_27, %c145] : memref<8x512xf32, #tpu.memory_space<vmem>>, vector<8x256xf32>
    %cst_28 = arith.constant 0.000000e+00 : f32
    %48 = vector.broadcast %cst_28 : f32 to vector<8x256xf32>
    %49 = arith.select %26, %47, %48 : vector<8x256xi1>, vector<8x256xf32>
    %50 = tpu.concatenate %31, %32, %35, %38, %39, %42, %45, %46, %49 in 0 : vector<8x256xf32>, vector<8x256xf32>, vector<8x256xf32>, vector<8x256xf32>, vector<8x256xf32>, vector<8x256xf32>, vector<8x256xf32>, vector<8x256xf32>, vector<8x256xf32> -> vector<72x256xf32>
    %51 = arith.truncf %50 : vector<72x256xf32> to vector<72x256xbf16>
    %cst_29 = arith.constant dense<0.000000e+00> : vector<8x256xf32>
    %52 = tpu.matmul %28, %51, %cst_29 {dimension_numbers = #tpu.dot_dimension_numbers<[1], [0], [0], [1], [0, 0, 1, 1], [], []>} : vector<8x72xbf16>, vector<72x256xbf16>, vector<8x256xf32> -> vector<8x256xf32>
    %c0_30 = arith.constant 0 : index
    %c0_31 = arith.constant 0 : index
    %53 = vector.load %arg3[%c0_30, %c0_31] : memref<8x1xf32, #tpu.memory_space<vmem>>, vector<8x1xf32>
    %54 = vector.broadcast %53 : vector<8x1xf32> to vector<8x256xf32>
    %55 = arith.addf %52, %54 : vector<8x256xf32>
    %cst_32 = arith.constant 0.000000e+00 : f32
    %56 = vector.broadcast %cst_32 : f32 to vector<8x256xf32>
    %57 = arith.maximumf %55, %56 : vector<8x256xf32>
    %c0_33 = arith.constant 0 : index
    %c128_34 = arith.constant 128 : index
    %58 = vector.load %arg7[%c0_33, %c128_34] : memref<8x512xf32, #tpu.memory_space<vmem>>, vector<8x256xf32>
    tpu.vector_store %arg7[%c0_33, %c128_34], %57 {strides = array<i32>} : memref<8x512xf32, #tpu.memory_space<vmem>>, vector<8x256xf32>,
    %c0_35 = arith.constant 0 : index
    %c0_36 = arith.constant 0 : index
    %59 = vector.load %arg4[%c0_35, %c0_36] : memref<8x72xbf16, #tpu.memory_space<vmem>>, vector<8x72xbf16>
    %c0_37 = arith.constant 0 : index
    %c111_38 = arith.constant 111 : index
    %60 = vector.load %arg7[%c0_37, %c111_38] : memref<8x512xf32, #tpu.memory_space<vmem>>, vector<8x256xf32>
    %cst_39 = arith.constant 0.000000e+00 : f32
    %61 = vector.broadcast %cst_39 : f32 to vector<8x256xf32>
    %62 = arith.select %24, %60, %61 : vector<8x256xi1>, vector<8x256xf32>
    %c0_40 = arith.constant 0 : index
    %c112_41 = arith.constant 112 : index
    %63 = vector.load %arg7[%c0_40, %c112_41] : memref<8x512xf32, #tpu.memory_space<vmem>>, vector<8x256xf32>
    %c0_42 = arith.constant 0 : index
    %c113_43 = arith.constant 113 : index
    %64 = vector.load %arg7[%c0_42, %c113_43] : memref<8x512xf32, #tpu.memory_space<vmem>>, vector<8x256xf32>
    %cst_44 = arith.constant 0.000000e+00 : f32
    %65 = vector.broadcast %cst_44 : f32 to vector<8x256xf32>
    %66 = arith.select %26, %64, %65 : vector<8x256xi1>, vector<8x256xf32>
    %c0_45 = arith.constant 0 : index
    %c127_46 = arith.constant 127 : index
    %67 = vector.load %arg7[%c0_45, %c127_46] : memref<8x512xf32, #tpu.memory_space<vmem>>, vector<8x256xf32>
    %cst_47 = arith.constant 0.000000e+00 : f32
    %68 = vector.broadcast %cst_47 : f32 to vector<8x256xf32>
    %69 = arith.select %24, %67, %68 : vector<8x256xi1>, vector<8x256xf32>
    %c0_48 = arith.constant 0 : index
    %c128_49 = arith.constant 128 : index
    %70 = vector.load %arg7[%c0_48, %c128_49] : memref<8x512xf32, #tpu.memory_space<vmem>>, vector<8x256xf32>
    %c0_50 = arith.constant 0 : index
    %c129_51 = arith.constant 129 : index
    %71 = vector.load %arg7[%c0_50, %c129_51] : memref<8x512xf32, #tpu.memory_space<vmem>>, vector<8x256xf32>
    %cst_52 = arith.constant 0.000000e+00 : f32
    %72 = vector.broadcast %cst_52 : f32 to vector<8x256xf32>
    %73 = arith.select %26, %71, %72 : vector<8x256xi1>, vector<8x256xf32>
    %c0_53 = arith.constant 0 : index
    %c143_54 = arith.constant 143 : index
    %74 = vector.load %arg7[%c0_53, %c143_54] : memref<8x512xf32, #tpu.memory_space<vmem>>, vector<8x256xf32>
    %cst_55 = arith.constant 0.000000e+00 : f32
    %75 = vector.broadcast %cst_55 : f32 to vector<8x256xf32>
    %76 = arith.select %24, %74, %75 : vector<8x256xi1>, vector<8x256xf32>
    %c0_56 = arith.constant 0 : index
    %c144_57 = arith.constant 144 : index
    %77 = vector.load %arg7[%c0_56, %c144_57] : memref<8x512xf32, #tpu.memory_space<vmem>>, vector<8x256xf32>
    %c0_58 = arith.constant 0 : index
    %c145_59 = arith.constant 145 : index
    %78 = vector.load %arg7[%c0_58, %c145_59] : memref<8x512xf32, #tpu.memory_space<vmem>>, vector<8x256xf32>
    %cst_60 = arith.constant 0.000000e+00 : f32
    %79 = vector.broadcast %cst_60 : f32 to vector<8x256xf32>
    %80 = arith.select %26, %78, %79 : vector<8x256xi1>, vector<8x256xf32>
    %81 = tpu.concatenate %62, %63, %66, %69, %70, %73, %76, %77, %80 in 0 : vector<8x256xf32>, vector<8x256xf32>, vector<8x256xf32>, vector<8x256xf32>, vector<8x256xf32>, vector<8x256xf32>, vector<8x256xf32>, vector<8x256xf32>, vector<8x256xf32> -> vector<72x256xf32>
    %82 = arith.truncf %81 : vector<72x256xf32> to vector<72x256xbf16>
    %cst_61 = arith.constant dense<0.000000e+00> : vector<8x256xf32>
    %83 = tpu.matmul %59, %82, %cst_61 {dimension_numbers = #tpu.dot_dimension_numbers<[1], [0], [0], [1], [0, 0, 1, 1], [], []>} : vector<8x72xbf16>, vector<72x256xbf16>, vector<8x256xf32> -> vector<8x256xf32>
    %c0_62 = arith.constant 0 : index
    %c0_63 = arith.constant 0 : index
    %84 = vector.load %arg5[%c0_62, %c0_63] : memref<8x1xf32, #tpu.memory_space<vmem>>, vector<8x1xf32>
    %85 = vector.broadcast %84 : vector<8x1xf32> to vector<8x256xf32>
    %86 = arith.addf %83, %85 : vector<8x256xf32>
    %87 = arith.addf %86, %5 : vector<8x256xf32>
    %cst_64 = arith.constant 0.000000e+00 : f32
    %88 = vector.broadcast %cst_64 : f32 to vector<8x256xf32>
    %89 = arith.maximumf %87, %88 : vector<8x256xf32>
    %c0_65 = arith.constant 0 : index
    %c0_66 = arith.constant 0 : index
    %c0_67 = arith.constant 0 : index
    %90 = vector.load %arg6[%c0_65, %c0_66, %c0_67] : memref<1x8x256xf32, #tpu.memory_space<vmem>>, vector<1x8x256xf32>
    %91 = vector.shape_cast %90 : vector<1x8x256xf32> to vector<8x256xf32>
    %92 = vector.shape_cast %89 : vector<8x256xf32> to vector<1x8x256xf32>
    tpu.vector_store %arg6[%c0_65, %c0_66, %c0_67], %92 {strides = array<i32>} : memref<1x8x256xf32, #tpu.memory_space<vmem>>, vector<1x8x256xf32>,
    return
  }
  func.func @transform_0(%arg0: i32) -> (i32, i32, i32) {
    %c0_i32 = arith.constant 0 : i32
    %c0_i32_0 = arith.constant 0 : i32
    %c0_i32_1 = arith.constant 0 : i32
    return %arg0, %c0_i32, %c0_i32_0 : i32, i32, i32
  }
  func.func @transform_1(%arg0: i32) -> (i32, i32) {
    %c0_i32 = arith.constant 0 : i32
    %c0_i32_0 = arith.constant 0 : i32
    %c0_i32_1 = arith.constant 0 : i32
    return %c0_i32, %c0_i32_0 : i32, i32
  }
  func.func @transform_2(%arg0: i32) -> (i32, i32) {
    %c0_i32 = arith.constant 0 : i32
    %c0_i32_0 = arith.constant 0 : i32
    %c0_i32_1 = arith.constant 0 : i32
    return %c0_i32, %c0_i32_0 : i32, i32
  }
  func.func @transform_3(%arg0: i32) -> (i32, i32) {
    %c0_i32 = arith.constant 0 : i32
    %c0_i32_0 = arith.constant 0 : i32
    %c0_i32_1 = arith.constant 0 : i32
    return %c0_i32, %c0_i32_0 : i32, i32
  }
  func.func @transform_4(%arg0: i32) -> (i32, i32) {
    %c0_i32 = arith.constant 0 : i32
    %c0_i32_0 = arith.constant 0 : i32
    %c0_i32_1 = arith.constant 0 : i32
    return %c0_i32, %c0_i32_0 : i32, i32
  }
  func.func @transform_5(%arg0: i32) -> (i32, i32, i32) {
    %c0_i32 = arith.constant 0 : i32
    %c0_i32_0 = arith.constant 0 : i32
    %c0_i32_1 = arith.constant 0 : i32
    return %arg0, %c0_i32, %c0_i32_0 : i32, i32, i32
  }
}

</mosaic_0001>

<bundles_post_ra>
// kernel: basic_block_forward.1
= control target key start
LH: loop header
LB: loop body
LE: loop exit
PB: predicated region body
PF: predicated region fallthrough
CT: control target
= control target key end

     0   :  { %s894_s18 = smov 0   ;;  %s1142_s0 = inlined_call_operand.vmem [shape: f32[2,8,256], index: 0, kind: input, shape index: {}]   ;;  %s1143_s1 = inlined_call_operand.vmem [shape: bf16[8,72], index: 1, kind: input, shape index: {}]   ;;  %s1144_s2 = inlined_call_operand.vmem [shape: f32[8,1], index: 2, kind: input, shape index: {}]   ;;  %s1145_s3 = inlined_call_operand.vmem [shape: bf16[8,72], index: 3, kind: input, shape index: {}]   ;;  %s1146_s4 = inlined_call_operand.vmem [shape: f32[8,1], index: 4, kind: input, shape index: {}]   ;;  %s1147_s5 = inlined_call_operand.vmem [shape: f32[2,8,256], index: 5, kind: output, shape index: {}]  }
   0x1 LB: > { %s680_s19 = sadd.s32 4294967295, %s851_s18   ;;  %p684_p0 = scmp.ge.s32.totalorder %s851_s18, 1  ;;  %s851_s18 = sphi %s894_s18, %s15_s18  }
   0x2   : > { %p187_p1 = scmp.lt.s32.totalorder %s851_s18, 3 }
   0x4   : > { %p188_p2 = pnand %p684_p0, %p187_p1 }
   0x5   : > { %p215_p3 = scmp.lt.s32.totalorder (!%p188_p2), %s680_s19, 1  ;;  %s854_s20 = smov (!%p188_p2), 111  }
   0x6   : > { %191 = sbr.rel (%p188_p2) target bundleno = 714 (0x2ca), region = 40  ;;  %s855_s25 = smov (!%p188_p2), 113  }
   0x7   : > { %s856_s26 = smov (!%p188_p2), 112   ;;  %s857_s27 = smov (!%p188_p2), 127  }
   0x8   : > { %s858_s28 = smov (!%p188_p2), 15   ;;  %s859_s29 = smov (!%p188_p2), 1  }
   0x9   : > { %s861_s30 = smov (!%p188_p2), 17   ;;  %s862_s6 = smov (!%p188_p2), 16  }
   0xb   : > { %v853_v0 = vmov 0.0   ;;  %s1184_s19 = smov (!%p215_p3, %s680_s19), 1  ;;  %v860_v5 = vmov 0   ;;  %v386_v6 = vld [vmem:[%s1144_s2] sm:$0xff]  ;;  %v230_v7 = vlaneseq  ;;  %vm347_vm0 = vcmask 908288  }
   0xc   : > { %345 = vrot.lane.b32.xlu0 %v853_v0, %s854_s20  ;;  %s743_s21 = sshll.u32 %s1184_s19, 4  ;;  %435 = vmatprep.mubr.bf16.mxu0 %v860_v5  ;;  %vm334_vm3 = vcmask 924672   ;;  %vm1149_vm4 = vcmask 1043456   ;;  %vm371_vm5 = vcmask 916480   ;;  %vm863_vm7 = vmmov 1  }
   0xd   : > { %s219_s24 = scalar_lea.vmem %s1142_s0, %s743_s21  ;;  %804 = vset.pattern.permute.xlu0 %v860_v5  ;;  %610 = vmatprep.mubr.bf16.mxu1 %v860_v5  ;;  %v231_v8 = vand.u32 127, %v230_v7  ;;  %vm1148_vm10 = vcmask 1039360   ;;  %vm289_vm14 = vcmask 121856   ;;  %vm1150_vm15 = vcmask 7168   ;;  %v448_v27 = vld [vmem:[%s1145_s3] sm:$0xf]  ;;  %s224_s17 = scalar_lea.vmem %s1147_s5, %s743_s21 }
   0xe   : > { %v912_v1 = vld [vmem:[%s219_s24 + $0x8] sm:$0xff]  ;;  %v914_v2 = vld [vmem:[%s219_s24] sm:$0xff] }
   0xf   : > { %v769_v3 = vpack.i.bf16 %v853_v0, %v912_v1  ;;  %v764_v4 = vpack.i.bf16 %v912_v1, %v914_v2  ;;  %v232_v9 = vadd.s32 128, %v231_v8  ;;  %v237_v12 = vand.u32 15, %v231_v8 }
  0x11   : > { %770 = vrot.lane.b32.xlu1 %v769_v3, %s855_s25  ;;  %765 = vrot.lane.b32.xlu0 %v764_v4, %s854_s20  ;;  %v244_v11 = vand.u32 15, %v232_v9  ;;  %vm953_vm2 = vcmp.lt.s32.totalorder %v237_v12, 15  ;;  %vm977_vm9 = vcmp.gt.s32.totalorder %v237_v12, 0 }
  0x12   : > { %vm989_vm11 = vmpackc.low %vm863_vm7, %vm977_vm9 }
  0x13   : > { %vm949_vm1 = vcmp.lt.s32.totalorder %v244_v11, 15  ;;  %vm963_vm6 = vcmp.gt.s32.totalorder %v244_v11, 0  ;;  %vm1011_vm13 = vmpackc.low %vm953_vm2, %vm863_vm7 }
  0x14   : > { %vm973_vm8 = vmpackc.low %vm863_vm7, %vm963_vm6 }
  0x15   : > { %775 = vrot.lane.b32.xlu1 %v769_v3, %s856_s26  ;;  %328 = vrot.lane.b32.xlu0 %v914_v2, %s855_s25  ;;  %vm997_vm12 = vmpackc.low %vm949_vm1, %vm863_vm7 }
  0x16   : > { %vm702_vm7 = vmpackc.low %vm963_vm6, %vm949_vm1 }
  0x19   : > { %365 = vrot.lane.b32.xlu1 %v914_v2, %s856_s26  ;;  %780 = vrot.lane.b32.xlu0 %v769_v3, %s857_s27 }
  0x1d   : > { %315 = vrot.lane.b32.xlu1 %v914_v2, %s857_s27  ;;  %785 = vrot.lane.b32.xlu0 %v764_v4, %s858_s28 }
  0x21   : > { %790 = vrot.lane.b32.xlu1 %v764_v4, %s859_s29  ;;  %283 = vrot.lane.b32.xlu0 %v853_v0, %s858_s28 }
  0x25   : > { %296 = vrot.lane.b32.xlu1 %v853_v0, %s859_s29  ;;  %795 = vrot.lane.b32.xlu0 %v764_v4, %s861_s30 }
  0x29   : > { %800 = vrot.lane.b32.xlu1 %v764_v4, %s862_s6  ;;  %270 = vrot.lane.b32.xlu0 %v853_v0, %s861_s30 }
  0x2d   : > { %354 = vrot.lane.b32.xlu1 %v853_v0, %s862_s6  ;;  %389 = vperm.xlu0 %804, %v386_v6  }
  0x31   : > { %525 = vrot.lane.b32.xlu1 %v853_v0, %s854_s20  ;;  %467 = vrot.lane.b32.xlu0 %v853_v0, %s858_s28 }
  0x7e   : > { %v346_v10 = vpop.permute.xlu0 %345 }
  0x83   : > { %v771_v13 = vpop.permute.xlu1 %770  ;;  %v766_v14 = vpop.permute.xlu0 %765 }
  0x84   : > { %v768_v15 = vunpack.i.h.bf16 %v766_v14  ;;  %v767_v16 = vunpack.i.l.bf16 %v766_v14  ;;  %v773_v19 = vunpack.i.h.bf16 %v771_v13  ;;  %v772_v20 = vunpack.i.l.bf16 %v771_v13 }
  0x86   : > { %v349_v21 = vsel %vm347_vm0, %v768_v15, %v346_v10  ;;  %v348_v22 = vsel %vm347_vm0, %v767_v16, %v768_v15  ;;  %v336_v32 = vsel %vm334_vm3, %v772_v20, %v773_v19 }
  0x87   : > { %v776_v23 = vpop.permute.xlu1 %775  ;;  %v329_v24 = vpop.permute.xlu0 %328  ;;  %v353_v25 = vsel %vm949_vm1, %v349_v21, 0.0  ;;  %v352_v26 = vsel %vm953_vm2, %v348_v22, 0.0  ;;  %v263_v22 = vld [vmem:[%s1143_s1] sm:$0xf] }
  0x88   : > { %v778_v28 = vunpack.i.h.bf16 %v776_v23  ;;  %v777_v29 = vunpack.i.l.bf16 %v776_v23  ;;  %v385_v30 = vpack.c.bf16 %v353_v25, %v353_v25  ;;  %v384_v31 = vpack.c.bf16 %v352_v26, %v352_v26 }
  0x89   : > { %v335_v40 = vsel %vm334_vm3, %v329_v24, %v772_v20 }
  0x8a   : > { %689 = vmatprep.subr.msk.bf16.mxu0 %vm1149_vm4, %v385_v30  ;;  %v373_v33 = vsel %vm371_vm5, %v777_v29, %v778_v28  ;;  %v398_v37 = vsel %vm1149_vm4, %v384_v31, 0  ;;  %vm1154_vm4 = vcmask 138240  }
  0x8b   : > { %v366_v36 = vpop.permute.xlu1 %365  ;;  %v781_v38 = vpop.permute.xlu0 %780  ;;  %v691_v39 = vpack.c.bf16 %v373_v33, %v336_v32  ;;  %410 = vmatpush1.bf16.msra.mxu0 %v398_v37  ;;  %v563_v37 = vld [vmem:[%s1146_s4] sm:$0xff] }
  0x8c   : > { %v372_v41 = vsel %vm371_vm5, %v366_v36, %v777_v29  ;;  %v783_v42 = vunpack.i.h.bf16 %v781_v38  ;;  %v782_v43 = vunpack.i.l.bf16 %v781_v38 }
  0x8d   : > { %v694_v44 = vpack.c.bf16 %v372_v41, %v335_v40  ;;  %692 = vmatprep.subr.msk.bf16.mxu0 %vm973_vm8, %v691_v39 }
  0x8e   : > { %v323_v46 = vsel %vm1148_vm10, %v782_v43, %v783_v42 }
  0x8f   : > { %v316_v48 = vpop.permute.xlu1 %315  ;;  %v786_v49 = vpop.permute.xlu0 %785  ;;  %v697_v50 = vpack.c.bf16 %v323_v46, %v912_v1  ;;  %695 = vmatpush1.bf16.msk.msra.mxu0 %vm989_vm11, %v694_v44 }
  0x90   : > { %v322_v51 = vsel %vm1148_vm10, %v316_v48, %v782_v43  ;;  %v788_v52 = vunpack.i.h.bf16 %v786_v49  ;;  %v787_v53 = vunpack.i.l.bf16 %v786_v49  ;;  %vm1151_vm10 = vmpackc.low %vm977_vm9, %vm953_vm2 }
  0x91   : > { %v700_v54 = vpack.c.bf16 %v322_v51, %v914_v2  ;;  %698 = vmatprep.subr.msk.bf16.mxu0 %vm997_vm12, %v697_v50 }
  0x92   : > { %v291_v60 = vsel %vm289_vm14, %v787_v53, %v788_v52 }
  0x93   : > { %v791_v56 = vpop.permute.xlu1 %790  ;;  %v284_v57 = vpop.permute.xlu0 %283  ;;  %701 = vmatpush1.bf16.msk.msra.mxu0 %vm1011_vm13, %v700_v54 }
  0x94   : > { %v793_v58 = vunpack.i.h.bf16 %v791_v56  ;;  %v792_v59 = vunpack.i.l.bf16 %v791_v56  ;;  %v290_v4 = vsel %vm289_vm14, %v284_v57, %v787_v53 }
  0x96   : > { %v304_v61 = vsel %vm1150_vm15, %v792_v59, %v793_v58 }
  0x97   : > { %v297_v62 = vpop.permute.xlu1 %296  ;;  %v796_v63 = vpop.permute.xlu0 %795  ;;  %v703_v3 = vpack.c.bf16 %v304_v61, %v291_v60 }
  0x98   : > { %v303_v5 = vsel %vm1150_vm15, %v297_v62, %v792_v59  ;;  %v798_v6 = vunpack.i.h.bf16 %v796_v63  ;;  %v797_v7 = vunpack.i.l.bf16 %v796_v63  ;;  %vm1153_vm15 = vcmask 130048  }
  0x99   : > { %v706_v8 = vpack.c.bf16 %v303_v5, %v290_v4  ;;  %704 = vmatprep.subr.msk.bf16.mxu0 %vm702_vm7, %v703_v3 }
  0x9a   : > { %v278_v12 = vsel %vm1154_vm4, %v797_v7, %v798_v6 }
  0x9b   : > { %v801_v9 = vpop.permute.xlu1 %800  ;;  %707 = vmatpush1.bf16.msk.msra.mxu0 %vm1151_vm10, %v706_v8  ;;  %v271_v13 = vpop.permute.xlu0 %270  ;;  %vm1152_vm10 = vcmask 588800  }
  0x9c   : > { %v803_v10 = vunpack.i.h.bf16 %v801_v9  ;;  %v802_v11 = vunpack.i.l.bf16 %v801_v9  ;;  %v277_v19 = vsel %vm1154_vm4, %v271_v13, %v797_v7 }
  0x9e   : > { %v362_v14 = vsel %vm1153_vm15, %v802_v11, %v803_v10 }
  0x9f   : > { %v355_v15 = vpop.permute.xlu1 %354  ;;  %v709_v16 = vpack.c.bf16 %v362_v14, %v278_v12 }
  0xa0   : > { %v361_v20 = vsel %vm1153_vm15, %v355_v15, %v802_v11  ;;  %vm1173_vm15 = vcmask 1039360  }
  0xa1   : > { %v712_v21 = vpack.c.bf16 %v361_v20, %v277_v19  ;;  %710 = vmatprep.subr.msk.bf16.mxu0 %vm973_vm8, %v709_v16  ;;  %vm1174_vm4 = vmmov %vm1173_vm15 }
  0xa3   : > { %713 = vmatpush1.bf16.msk.msra.mxu0 %vm989_vm11, %v712_v21  ;;  %v526_v38 = vpop.permute.xlu1 %525 }
  0xa6   : > { %714 = vmatmul.mubr.msk.bf16.vlgmr.msra.gmra.mxu0 %vm1152_vm10, %v263_v22 }
  0xa8   : > { %v390_v23 = vpop.permute.xlu0 %389 }
  0xac   : > { %v468_v39 = vpop.permute.xlu0 %467 }
 0x166   : > { %v437_v24 = vpop.f32.mrf.mxu0 }
 0x167   : > { %v438_v25 = vadd.f32 %v437_v24, %v390_v23 }
 0x168   : > { %v439_v26 = vpop.f32.mrf.mxu0 }
 0x169   : > { %v1051_v28 = vmax.f32 %v438_v25, 0.0  ;;  %v440_v29 = vadd.f32 %v439_v26, %v390_v23 }
 0x16a   : > { %v441_v30 = vpop.f32.mrf.mxu0 }
 0x16b   : > { %v1053_v31 = vmax.f32 %v440_v29, 0.0  ;;  %543 = vrot.lane.b32.xlu1 %v1051_v28, %s856_s26  ;;  %509 = vrot.lane.b32.xlu0 %v1051_v28, %s855_s25 }
 0x16c   : > { %v442_v32 = vpop.f32.mrf.mxu0 }
 0x16d   : > { %v810_v33 = vpack.i.bf16 %v853_v0, %v1053_v31  ;;  %v805_v36 = vpack.i.bf16 %v1053_v31, %v1051_v28 }
 0x16f   : > { %497 = vrot.lane.b32.xlu1 %v1051_v28, %s857_s27  ;;  %811 = vrot.lane.b32.xlu0 %v810_v33, %s855_s25 }
 0x173   : > { %806 = vrot.lane.b32.xlu1 %v805_v36, %s854_s20  ;;  %821 = vrot.lane.b32.xlu0 %v810_v33, %s857_s27 }
 0x177   : > { %816 = vrot.lane.b32.xlu1 %v810_v33, %s856_s26  ;;  %826 = vrot.lane.b32.xlu0 %v805_v36, %s858_s28 }
 0x17b   : > { %479 = vrot.lane.b32.xlu1 %v853_v0, %s859_s29  ;;  %836 = vrot.lane.b32.xlu0 %v805_v36, %s861_s30 }
 0x17f   : > { %831 = vrot.lane.b32.xlu1 %v805_v36, %s859_s29  ;;  %455 = vrot.lane.b32.xlu0 %v853_v0, %s861_s30 }
 0x183   : > { %841 = vrot.lane.b32.xlu1 %v805_v36, %s862_s6  ;;  %566 = vperm.xlu0 %804, %v563_v37  }
 0x187   : > { %533 = vrot.lane.b32.xlu1 %v853_v0, %s862_s6 }
 0x1dd   : > { %v544_v40 = vpop.permute.xlu1 %543  ;;  %v510_v41 = vpop.permute.xlu0 %509 }
 0x1e1   : > { %v498_v42 = vpop.permute.xlu1 %497  ;;  %v812_v43 = vpop.permute.xlu0 %811 }
 0x1e2   : > { %v814_v50 = vunpack.i.h.bf16 %v812_v43  ;;  %v813_v51 = vunpack.i.l.bf16 %v812_v43 }
 0x1e4   : > { %v516_v3 = vsel %vm334_vm3, %v813_v51, %v814_v50  ;;  %v515_v10 = vsel %vm334_vm3, %v510_v41, %v813_v51  ;;  %vm1175_vm3 = vcmask 7168  }
 0x1e5   : > { %v807_v44 = vpop.permute.xlu1 %806  ;;  %v822_v46 = vpop.permute.xlu0 %821 }
 0x1e6   : > { %v809_v48 = vunpack.i.h.bf16 %v807_v44  ;;  %v808_v49 = vunpack.i.l.bf16 %v807_v44  ;;  %v824_v57 = vunpack.i.h.bf16 %v822_v46  ;;  %v823_v58 = vunpack.i.l.bf16 %v822_v46 }
 0x1e8   : > { %v528_v52 = vsel %vm347_vm0, %v809_v48, %v526_v38  ;;  %v527_v53 = vsel %vm347_vm0, %v808_v49, %v809_v48  ;;  %vm1171_vm0 = vcmask 1043456   ;;  %v504_v9 = vsel %vm1173_vm15, %v823_v58, %v824_v57 }
 0x1e9   : > { %v817_v54 = vpop.permute.xlu1 %816  ;;  %v532_v0 = vsel %vm949_vm1, %v528_v52, 0.0  ;;  %v531_v56 = vsel %vm953_vm2, %v527_v53, 0.0  ;;  %v827_v61 = vpop.permute.xlu0 %826  ;;  %vm1172_vm10 = vmmov %vm1171_vm0  ;;  %v503_v11 = vsel %vm1174_vm4, %v498_v42, %v823_v58  ;;  %v723_v15 = vpack.c.bf16 %v504_v9, %v1053_v31 }
 0x1ea   : > { %v819_v59 = vunpack.i.h.bf16 %v817_v54  ;;  %v818_v60 = vunpack.i.l.bf16 %v817_v54  ;;  %v562_v62 = vpack.c.bf16 %v532_v0, %v532_v0  ;;  %v561_v63 = vpack.c.bf16 %v531_v56, %v531_v56  ;;  %vm1176_vm4 = vmmov %vm1175_vm3 }
 0x1eb   : > { %v829_v13 = vunpack.i.h.bf16 %v827_v61  ;;  %v828_v14 = vunpack.i.l.bf16 %v827_v61  ;;  %v726_v22 = vpack.c.bf16 %v503_v11, %v1051_v28  ;;  %vm1182_vm1 = vcmask 588800  }
 0x1ec   : > { %v550_v4 = vsel %vm371_vm5, %v818_v60, %v819_v59  ;;  %v549_v5 = vsel %vm371_vm5, %v544_v40, %v818_v60  ;;  %715 = vmatprep.subr.msk.bf16.mxu1 %vm1171_vm0, %v562_v62  ;;  %v573_v8 = vsel %vm1172_vm10, %v561_v63, 0  ;;  %vm1177_vm5 = vcmask 138240  }
 0x1ed   : > { %v717_v6 = vpack.c.bf16 %v550_v4, %v516_v3  ;;  %v480_v7 = vpop.permute.xlu1 %479  ;;  %585 = vmatpush1.bf16.msra.mxu1 %v573_v8  ;;  %v720_v12 = vpack.c.bf16 %v549_v5, %v515_v10  ;;  %v837_v16 = vpop.permute.xlu0 %836  ;;  %v474_v23 = vsel %vm289_vm14, %v828_v14, %v829_v13  ;;  %v473_v28 = vsel %vm289_vm14, %v468_v39, %v828_v14  ;;  %vm1181_vm14 = vmpackc.low %vm977_vm9, %vm953_vm2 }
 0x1ee   : > { %v839_v24 = vunpack.i.h.bf16 %v837_v16  ;;  %v838_v25 = vunpack.i.l.bf16 %v837_v16  ;;  %vm1178_vm10 = vcmask 130048  }
 0x1ef   : > { %718 = vmatprep.subr.msk.bf16.mxu1 %vm973_vm8, %v717_v6 }
 0x1f0   : > { %v462_v47 = vsel %vm1177_vm5, %v838_v25, %v839_v24 }
 0x1f1   : > { %v832_v19 = vpop.permute.xlu1 %831  ;;  %721 = vmatpush1.bf16.msk.msra.mxu1 %vm989_vm11, %v720_v12  ;;  %v456_v36 = vpop.permute.xlu0 %455 }
 0x1f2   : > { %v834_v20 = vunpack.i.h.bf16 %v832_v19  ;;  %v833_v21 = vunpack.i.l.bf16 %v832_v19  ;;  %724 = vmatprep.subr.msk.bf16.mxu1 %vm997_vm12, %v723_v15  ;;  %vm1179_vm12 = vmmov %vm1177_vm5 }
 0x1f3   : > { %v461_v55 = vsel %vm1179_vm12, %v456_v36, %v838_v25 }
 0x1f4   : > { %v486_v26 = vsel %vm1175_vm3, %v833_v21, %v834_v20  ;;  %v485_v29 = vsel %vm1176_vm4, %v480_v7, %v833_v21 }
 0x1f5   : > { %v729_v30 = vpack.c.bf16 %v486_v26, %v474_v23  ;;  %v842_v31 = vpop.permute.xlu1 %841  ;;  %727 = vmatpush1.bf16.msk.msra.mxu1 %vm1011_vm13, %v726_v22  ;;  %v732_v37 = vpack.c.bf16 %v485_v29, %v473_v28  ;;  %vm1180_vm13 = vmmov %vm1178_vm10 }
 0x1f6   : > { %v844_v32 = vunpack.i.h.bf16 %v842_v31  ;;  %v843_v33 = vunpack.i.l.bf16 %v842_v31 }
 0x1f7   : > { %730 = vmatprep.subr.msk.bf16.mxu1 %vm702_vm7, %v729_v30 }
 0x1f8   : > { %v540_v38 = vsel %vm1178_vm10, %v843_v33, %v844_v32 }
 0x1f9   : > { %v735_v40 = vpack.c.bf16 %v540_v38, %v462_v47  ;;  %v534_v41 = vpop.permute.xlu1 %533  ;;  %733 = vmatpush1.bf16.msk.msra.mxu1 %vm1181_vm14, %v732_v37 }
 0x1fa   : > { %v539_v42 = vsel %vm1180_vm13, %v534_v41, %v843_v33 }
 0x1fb   : > { %v738_v17 = vpack.c.bf16 %v539_v42, %v461_v55  ;;  %736 = vmatprep.subr.msk.bf16.mxu1 %vm973_vm8, %v735_v40 }
 0x1fd   : > { %739 = vmatpush1.bf16.msk.msra.mxu1 %vm989_vm11, %v738_v17 }
 0x1fe   : > { %v567_v39 = vpop.permute.xlu0 %566 }
 0x200   : > { %740 = vmatmul.mubr.msk.bf16.vlgmr.msra.gmra.mxu1 %vm1182_vm1, %v448_v27 }
 0x2c0   : > { %v612_v43 = vpop.f32.mrf.mxu1 }
 0x2c1   : > { %v613_v35 = vadd.f32 %v612_v43, %v567_v39 }
 0x2c2   : > { %v614_v44 = vpop.f32.mrf.mxu1 }
 0x2c3   : > { %v619_v18 = vadd.f32 %v613_v35, %v914_v2  ;;  %v615_v46 = vadd.f32 %v614_v44, %v567_v39 }
 0x2c4   : > { %v616_v34 = vpop.f32.mrf.mxu1 }
 0x2c5   : > { %v621_v45 = vmax.f32 %v619_v18, 0.0  ;;  %v620_v48 = vadd.f32 %v615_v46, %v912_v1 }
 0x2c6   : > { %v617_v49 = vpop.f32.mrf.mxu1 }
 0x2c7   : > { %623 = vst [vmem:[%s224_s17] sm:$0xff] %v621_v45  ;;  %v622_v50 = vmax.f32 %v620_v48, 0.0 }
 0x2c9   : > { %624 = vst [vmem:[%s224_s17 + $0x8] sm:$0xff] %v622_v50 }
 0x2ca PF: > { %s15_s18 = sadd.s32 1, %s851_s18  }
 0x2cb   : > { %p12_p4 = scmp.ge.s32.totalorder %s15_s18, 4  }
 0x2cd   :  { %14 = sbr.rel (!%p12_p4) target bundleno = 1 (0x1), region = 70 }

</bundles_post_ra>
